<compile_context>
chip_gen: v5e
topology: v5e:2x2
jax: 0.10.0
libtpu: 0.0.40
codegen_flags: <defaults>
</compile_context>

<pallas_src>
import functools

import jax
import jax.numpy as jnp
from jax import lax
from jax.experimental import pallas as pl
from jax.experimental.pallas import tpu as pltpu

# --- "cfg" values (deterministic, in-script) ---------------------------------
TRIPLET_MARGIN = 0.3         # cfg.LOSS.TRIPLET_MARGIN
NORM_FEATURE = True          # cfg.TRAIN.NORM_FEATURE
USE_IDENTITY_SAMPLER = True  # cfg.DATALOADER.USE_IDENTITY_SAMPLER


def _triplet_loss_kernel(x_ref, lbl_row_ref, lbl_col_ref, hinge_ref, *,
                         margin, tm, mxu_dtype):
    """One anchor-row block.

    x_ref:       (N, D)  features, native dtype, resident (constant index_map)
    lbl_row_ref: (1, N)  int32 labels, lane-dense, resident
    lbl_col_ref: (TM, 1) int32 labels for this anchor block
    hinge_ref:   (TM, 1) f32 per-anchor hinge loss (output block)
    """
    i = pl.program_id(0)

    # Full gallery, normalized in f32.  rsqrt runs on the EUP (its own VLIW
    # slot).  +1e-22 (= (1e-11)^2) guards the zero-vector case; for
    # non-degenerate rows the deviation from the reference "/(norm + 1e-11)"
    # is ~1e-11 relative.
    xg = x_ref[...].astype(jnp.float32)                               # (N, D)
    gal_sumsq = jnp.sum(xg * xg, axis=-1, keepdims=True)              # (N, 1)
    gal_n = xg * lax.rsqrt(gal_sumsq + jnp.float32(1e-22))            # (N, D)

    # Anchor rows for this block: slice the same resident feature block (no
    # extra DMA), re-normalize the TM rows (negligible work).
    row0 = pl.multiple_of(i * tm, tm)
    xa = x_ref[pl.ds(row0, tm), :].astype(jnp.float32)                # (TM, D)
    anc_sumsq = jnp.sum(xa * xa, axis=-1, keepdims=True)
    anc_n = xa * lax.rsqrt(anc_sumsq + jnp.float32(1e-22))            # (TM, D)

    # NT-form gram on the MXU: both operands contract on their last (lane)
    # dim, so no transposed copy is materialized.  Operands go to mxu_dtype
    # (bf16 by default -> bf16-native MXU on v5e/v6e/v7x); accumulation is f32.
    gram = lax.dot_general(
        anc_n.astype(mxu_dtype), gal_n.astype(mxu_dtype),
        dimension_numbers=(((1,), (1,)), ((), ())),
        preferred_element_type=jnp.float32)                           # (TM, N)

    # Unit-norm rows => ||a||^2 + ||g||^2 - 2 a.g == 2 - 2*gram (clamped like
    # the reference's .clamp(min=1e-12)).  Mining happens on squared distances
    # (sqrt is monotone, selection unchanged); sqrt is applied only to the
    # selected (TM,1) vectors below.
    dist2 = jnp.maximum(2.0 - 2.0 * gram, jnp.float32(1e-12))         # (TM, N)

    # is_pos includes the diagonal (matches the torch code).  Identity sampler
    # guarantees >=2 samples per id, so the ~1e-6 diagonal distance is never
    # the hardest positive.
    is_pos = lbl_col_ref[...] == lbl_row_ref[...]                     # (TM, N)

    big = jnp.float32(1e30)
    # dist2 >= 0, so masking positives-only max with 0.0 is safe (diagonal is
    # always a positive candidate).
    ap2 = jnp.max(jnp.where(is_pos, dist2, 0.0), axis=-1, keepdims=True)   # (TM,1)
    an2 = jnp.min(jnp.where(is_pos, big, dist2), axis=-1, keepdims=True)   # (TM,1)

    dist_ap = jnp.sqrt(ap2)
    dist_an = jnp.sqrt(an2)   # no negatives -> sqrt(1e30) ~ 1e15 -> hinge = 0

    # MarginRankingLoss(margin)(dist_an, dist_ap, y=1) per anchor:
    #   max(0, -(dist_an - dist_ap) + margin)
    hinge_ref[...] = jnp.maximum(dist_ap - dist_an + jnp.float32(margin), 0.0)


def triplet_loss(global_feat, labels, margin=TRIPLET_MARGIN,
                 mxu_dtype=jnp.bfloat16):
    """global_feat: (N, D) float (native dtype, no wrapper cast),
    labels: (N,) int  ->  scalar float32 loss."""
    n, d = global_feat.shape

    # Anchor-row tile.  TM must divide N (padded anchor rows would read OOB of
    # the resident gallery block) and be a multiple of 8 (or equal N).
    tm = min(128, n)
    while n % tm != 0:
        tm //= 2
    assert tm >= 1 and n % tm == 0
    grid = (n // tm,)

    lbl_row = labels.reshape(1, n).astype(jnp.int32)   # lane-dense, resident
    lbl_col = labels.reshape(n, 1).astype(jnp.int32)   # sliced (TM,1) per block

    kernel = functools.partial(_triplet_loss_kernel, margin=float(margin),
                               tm=tm, mxu_dtype=mxu_dtype)
    vmem = pltpu.MemorySpace.VMEM

    per_anchor = pl.pallas_call(
        kernel,
        out_shape=jax.ShapeDtypeStruct((n, 1), jnp.float32),
        grid=grid,
        in_specs=[
            # Full gallery, constant index_map -> DMA'd once, stays resident.
            pl.BlockSpec((n, d), lambda i: (0, 0), memory_space=vmem),
            # Labels as a lane-dense (1, N) row, resident.
            pl.BlockSpec((1, n), lambda i: (0, 0), memory_space=vmem),
            # Per-block anchor labels column (TM, 1).
            pl.BlockSpec((tm, 1), lambda i: (i, 0), memory_space=vmem),
        ],
        out_specs=pl.BlockSpec((tm, 1), lambda i: (i, 0), memory_space=vmem),
        compiler_params=pltpu.CompilerParams(
            dimension_semantics=("parallel",)),   # v7x dual-TC; no-op on v5e/v6e
    )(global_feat, lbl_row, lbl_col)

    # Mean reduction of MarginRankingLoss (tiny wrapper-side reduce; avoids a
    # scalar accumulator across the "parallel" grid axis).
    return jnp.mean(per_anchor)


def _reference_loss(global_feat, labels, margin=TRIPLET_MARGIN):
    # pure-JAX mirror of the PyTorch module semantics
    x = global_feat.astype(jnp.float32)
    x = x / (jnp.linalg.norm(x, axis=-1, keepdims=True) + 1e-11)
    sq = jnp.sum(x * x, axis=-1, keepdims=True)
    dist2 = sq + sq.T - 2.0 * (x @ x.T)
    dist = jnp.sqrt(jnp.maximum(dist2, 1e-12))
    is_pos = labels[:, None] == labels[None, :]
    dist_ap = jnp.max(jnp.where(is_pos, dist, -1e30), axis=-1)
    dist_an = jnp.min(jnp.where(is_pos, 1e30, dist), axis=-1)
    return jnp.mean(jnp.maximum(dist_ap - dist_an + margin, 0.0))


if __name__ == "__main__":
    # N = 8 anchors (4 identities x 2 samples each, identity-sampler layout), D = 32.
    key = jax.random.PRNGKey(0)
    N, D = 8, 32
    global_feat = jax.random.normal(key, (N, D), dtype=jnp.float32)
    labels = jnp.array([0, 0, 1, 1, 2, 2, 3, 3], dtype=jnp.int32)

    ref = _reference_loss(global_feat, labels)

    # Exact-numerics path (f32 MXU operands) vs. the PyTorch-mirroring reference.
    loss_f32 = triplet_loss(global_feat, labels, mxu_dtype=jnp.float32)
    jax.block_until_ready(loss_f32)
    assert jnp.allclose(loss_f32, ref, atol=1e-5), (loss_f32, ref)

    # Default fast path (bf16 MXU operands, f32 accumulate / element-wise math).
    loss_bf16 = triplet_loss(global_feat, labels)
    jax.block_until_ready(loss_bf16)
    assert jnp.allclose(loss_bf16, ref, atol=5e-3), (loss_bf16, ref)

    print("KERNEL_OK")
</pallas_src>

<mosaic_0001>
module attributes {stable_mosaic.version = 11 : i64} {
  func.func @_triplet_loss_kernel(%arg0: i32, %arg1: memref<8x32xf32, #tpu.memory_space<vmem>>, %arg2: memref<1x8xi32, #tpu.memory_space<vmem>>, %arg3: memref<8x1xi32, #tpu.memory_space<vmem>>, %arg4: memref<8x1xf32, #tpu.memory_space<vmem>>) attributes {dimension_semantics = [#tpu.dimension_semantics<parallel>], iteration_bounds = array<i64: 1>, scalar_prefetch = 0 : i64, scratch_operands = 0 : i64, tpu.core_type = #tpu.core_type<tc>, window_params = [{pipeline_mode = #tpu.pipeline_mode<synchronous>, transform_indices = @transform_0, window_bounds = array<i64: 8, 32>}, {pipeline_mode = #tpu.pipeline_mode<synchronous>, transform_indices = @transform_1, window_bounds = array<i64: 1, 8>}, {transform_indices = @transform_2, window_bounds = array<i64: 8, 1>}, {transform_indices = @transform_3, window_bounds = array<i64: 8, 1>}]} {
    %c0 = arith.constant 0 : index
    %c0_0 = arith.constant 0 : index
    %0 = vector.load %arg1[%c0, %c0_0] : memref<8x32xf32, #tpu.memory_space<vmem>>, vector<8x32xf32>
    %1 = arith.mulf %0, %0 : vector<8x32xf32>
    %cst = arith.constant dense<0.000000e+00> : vector<8xf32>
    %2 = vector.multi_reduction <add>, %1, %cst [1] : vector<8x32xf32> to vector<8xf32>
    %3 = vector.shape_cast %2 : vector<8xf32> to vector<8x1xf32>
    %cst_1 = arith.constant 1.000000e-22 : f32
    %4 = vector.broadcast %cst_1 : f32 to vector<8x1xf32>
    %5 = arith.addf %3, %4 : vector<8x1xf32>
    %6 = math.rsqrt %5 : vector<8x1xf32>
    %7 = vector.broadcast %6 : vector<8x1xf32> to vector<8x32xf32>
    %8 = arith.mulf %0, %7 : vector<8x32xf32>
    %c8_i32 = arith.constant 8 : i32
    %9 = arith.muli %arg0, %c8_i32 : i32
    %10 = tpu.assume_multiple %9, 8 : i32
    %11 = arith.index_cast %10 : i32 to index
    %c0_2 = arith.constant 0 : index
    %12 = vector.load %arg1[%11, %c0_2] : memref<8x32xf32, #tpu.memory_space<vmem>>, vector<8x32xf32>
    %13 = arith.mulf %12, %12 : vector<8x32xf32>
    %cst_3 = arith.constant dense<0.000000e+00> : vector<8xf32>
    %14 = vector.multi_reduction <add>, %13, %cst_3 [1] : vector<8x32xf32> to vector<8xf32>
    %15 = vector.shape_cast %14 : vector<8xf32> to vector<8x1xf32>
    %cst_4 = arith.constant 1.000000e-22 : f32
    %16 = vector.broadcast %cst_4 : f32 to vector<8x1xf32>
    %17 = arith.addf %15, %16 : vector<8x1xf32>
    %18 = math.rsqrt %17 : vector<8x1xf32>
    %19 = vector.broadcast %18 : vector<8x1xf32> to vector<8x32xf32>
    %20 = arith.mulf %12, %19 : vector<8x32xf32>
    %cst_5 = arith.constant dense<0.000000e+00> : vector<8x8xf32>
    %21 = tpu.matmul %20, %8, %cst_5 {dimension_numbers = #tpu.dot_dimension_numbers<[1], [1], [0], [0], [0, 0, 1, 0], [], []>} : vector<8x32xf32>, vector<8x32xf32>, vector<8x8xf32> -> vector<8x8xf32>
    %cst_6 = arith.constant 2.000000e+00 : f32
    %22 = vector.broadcast %cst_6 : f32 to vector<8x8xf32>
    %23 = arith.mulf %22, %21 : vector<8x8xf32>
    %cst_7 = arith.constant 2.000000e+00 : f32
    %24 = vector.broadcast %cst_7 : f32 to vector<8x8xf32>
    %25 = arith.subf %24, %23 : vector<8x8xf32>
    %cst_8 = arith.constant 9.99999996E-13 : f32
    %26 = vector.broadcast %cst_8 : f32 to vector<8x8xf32>
    %27 = arith.maximumf %25, %26 : vector<8x8xf32>
    %c0_9 = arith.constant 0 : index
    %c0_10 = arith.constant 0 : index
    %28 = vector.load %arg3[%c0_9, %c0_10] : memref<8x1xi32, #tpu.memory_space<vmem>>, vector<8x1xi32>
    %c0_11 = arith.constant 0 : index
    %c0_12 = arith.constant 0 : index
    %29 = vector.load %arg2[%c0_11, %c0_12] : memref<1x8xi32, #tpu.memory_space<vmem>>, vector<1x8xi32>
    %30 = vector.broadcast %28 : vector<8x1xi32> to vector<8x8xi32>
    %31 = vector.broadcast %29 : vector<1x8xi32> to vector<8x8xi32>
    %32 = arith.cmpi eq, %30, %31 : vector<8x8xi32>
    %cst_13 = arith.constant 0.000000e+00 : f32
    %33 = vector.broadcast %cst_13 : f32 to vector<8x8xf32>
    %34 = arith.select %32, %27, %33 : vector<8x8xi1>, vector<8x8xf32>
    %cst_14 = arith.constant dense<0xFF800000> : vector<8xf32>
    %35 = vector.multi_reduction <maximumf>, %34, %cst_14 [1] : vector<8x8xf32> to vector<8xf32>
    %36 = vector.shape_cast %35 : vector<8xf32> to vector<8x1xf32>
    %cst_15 = arith.constant 1.000000e+30 : f32
    %37 = vector.broadcast %cst_15 : f32 to vector<8x8xf32>
    %38 = arith.select %32, %37, %27 : vector<8x8xi1>, vector<8x8xf32>
    %cst_16 = arith.constant dense<0x7F800000> : vector<8xf32>
    %39 = vector.multi_reduction <minimumf>, %38, %cst_16 [1] : vector<8x8xf32> to vector<8xf32>
    %40 = vector.shape_cast %39 : vector<8xf32> to vector<8x1xf32>
    %41 = math.sqrt %36 : vector<8x1xf32>
    %42 = math.sqrt %40 : vector<8x1xf32>
    %43 = arith.subf %41, %42 : vector<8x1xf32>
    %cst_17 = arith.constant 3.000000e-01 : f32
    %44 = vector.broadcast %cst_17 : f32 to vector<8x1xf32>
    %45 = arith.addf %43, %44 : vector<8x1xf32>
    %cst_18 = arith.constant 0.000000e+00 : f32
    %46 = vector.broadcast %cst_18 : f32 to vector<8x1xf32>
    %47 = arith.maximumf %45, %46 : vector<8x1xf32>
    %c0_19 = arith.constant 0 : index
    %c0_20 = arith.constant 0 : index
    %48 = vector.load %arg4[%c0_19, %c0_20] : memref<8x1xf32, #tpu.memory_space<vmem>>, vector<8x1xf32>
    tpu.vector_store %arg4[%c0_19, %c0_20], %47 {strides = array<i32>} : memref<8x1xf32, #tpu.memory_space<vmem>>, vector<8x1xf32>,
    return
  }
  func.func @transform_0(%arg0: i32) -> (i32, i32) {
    %c0_i32 = arith.constant 0 : i32
    %c0_i32_0 = arith.constant 0 : i32
    %c0_i32_1 = arith.constant 0 : i32
    return %c0_i32, %c0_i32_0 : i32, i32
  }
  func.func @transform_1(%arg0: i32) -> (i32, i32) {
    %c0_i32 = arith.constant 0 : i32
    %c0_i32_0 = arith.constant 0 : i32
    %c0_i32_1 = arith.constant 0 : i32
    return %c0_i32, %c0_i32_0 : i32, i32
  }
  func.func @transform_2(%arg0: i32) -> (i32, i32) {
    %c0_i32 = arith.constant 0 : i32
    %c0_i32_0 = arith.constant 0 : i32
    return %arg0, %c0_i32 : i32, i32
  }
  func.func @transform_3(%arg0: i32) -> (i32, i32) {
    %c0_i32 = arith.constant 0 : i32
    %c0_i32_0 = arith.constant 0 : i32
    return %arg0, %c0_i32 : i32, i32
  }
}

</mosaic_0001>

<bundles_post_ra>
// kernel: tpu_custom_call.1
= control target key start
LH: loop header
LB: loop body
LE: loop exit
PB: predicated region body
PF: predicated region fallthrough
CT: control target
= control target key end

     0   :  { %vm16_vm0 = vcmask 261120   ;;  %v143_v5 = vmov 0   ;;  %vm88_vm8 = vcmask 64512   ;;  %vm123_vm13 = vcmask 7168   ;;  %s179_s0 = inlined_call_operand.vmem [shape: f32[8,32], index: 0, kind: input, shape index: {}]   ;;  %s180_s2 = inlined_call_operand.vmem [shape: s32[8,1], index: 2, kind: input, shape index: {}]   ;;  %s181_s1 = inlined_call_operand.vmem [shape: s32[1,8], index: 1, kind: input, shape index: {}]   ;;  %s182_s3 = inlined_call_operand.vmem [shape: f32[8,1], index: 3, kind: output, shape index: {}]  }
   0x1   :  { %v14_v0 = vld [vmem:[%s179_s0] sm:$0xff]  ;;  %132 = vset.pattern.permute.xlu1 %v143_v5  ;;  %133 = vset.pattern.permute.xlu0 %v143_v5 }
   0x2   :  { %v15_v1 = vmul.f32 %v14_v0, %v14_v0  ;;  %v80_v3 = vld [vmem:[%s180_s2] sm:$0xff] }
   0x3   :  { %83 = vperm.xlu1 %132, %v80_v3   ;;  %v134_v26 = vld [vmem:[%s181_s1] ss:$0 sm:$0xff] }
   0x4   :  { %v17_v2 = vsel %vm16_vm0, %v15_v1, 0.0 }
   0x5   :  { %18 = vadd.xlane.f32.xlu0 %v17_v2 }
   0xd   :  { %37 = vadd.xlane.f32.xlu0 %v17_v2 }
  0x75   :  { %v84_v28 = vpop.permute.xlu1 %83 }
  0x76   :  { %vm86_vm7 = vcmp.eq.s32.totalorder %v84_v28, %v134_v26 }
  0x78   :  { %v19_v4 = vpop.xlane.xlu0 %18 }
  0x79   :  { %v20_v6 = vadd.f32 1e-22, %v19_v4 }
  0x7b   :  { %135 = vrsqrt.f32 %v20_v6  ;;  %vm27_vm2 = vweird.f32 %v20_v6 }
  0x80   :  { %v38_v7 = vpop.xlane.xlu0 %37 }
  0x81   :  { %v136_v8 = vpop.eup %135  ;;  %v39_v9 = vadd.f32 1e-22, %v38_v7 }
  0x82   :  { %v22_v10 = vmul.f32 %v136_v8, %v20_v6  ;;  %vm28_vm1 = vweird.f32 %v136_v8 }
  0x83   :  { %137 = vrsqrt.f32 %v39_v9  ;;  %vm29_vm3 = vmor %vm27_vm2, %vm28_vm1  ;;  %vm46_vm5 = vweird.f32 %v39_v9 }
  0x84   :  { %v23_v11 = vmul.f32 %v136_v8, %v22_v10 }
  0x86   :  { %v24_v12 = vmul.f32 0.5, %v23_v11 }
  0x88   :  { %v25_v13 = vsub.f32 1.5, %v24_v12 }
  0x89   :  { %v138_v14 = vpop.eup %137 }
  0x8a   :  { %v41_v15 = vmul.f32 %v138_v14, %v39_v9  ;;  %v26_v16 = vmul.f32 %v136_v8, %v25_v13  ;;  %vm47_vm4 = vweird.f32 %v138_v14 }
  0x8b   :  { %vm48_vm6 = vmor %vm46_vm5, %vm47_vm4 }
  0x8c   :  { %v42_v17 = vmul.f32 %v138_v14, %v41_v15  ;;  %v30_v18 = vsel %vm29_vm3, %v136_v8, %v26_v16 }
  0x8d   :  { %v31_v19 = vmul.f32 %v30_v18, %v14_v0 }
  0x8e   :  { %v43_v20 = vmul.f32 0.5, %v42_v17 }
  0x8f   :  { %129 = vmatpush.xpose.msk.msra.mxu0 %vm16_vm0, %v31_v19 }
  0x90   :  { %v44_v21 = vsub.f32 1.5, %v43_v20 }
  0x92   :  { %v45_v22 = vmul.f32 %v138_v14, %v44_v21 }
  0x94   :  { %v49_v23 = vsel %vm48_vm6, %v138_v14, %v45_v22 }
  0x95   :  { %v50_v24 = vmul.f32 %v49_v23, %v14_v0 }
  0x97   :  { %130 = vmatmul.msk.f32.vlgmr.msra.gmra.mxu0 %vm16_vm0, %v50_v24 }
 0x114   :  { %v74_v25 = vpop.f32.mrf.mxu0 }
 0x115   :  { %v77_v27 = vmul.f32 2.0, %v74_v25 }
 0x117   :  { %v78_v29 = vsub.f32 2.0, %v77_v27 }
 0x119   :  { %v79_v30 = vmax.f32 %v78_v29, 1e-12 }
 0x11b   :  { %v92_v31 = vsel %vm86_vm7, 1e+30, %v79_v30  ;;  %v87_v32 = vsel %vm86_vm7, %v79_v30, 0.0 }
 0x11c   :  { %v93_v33 = vsel %vm88_vm8, %v92_v31, inf  ;;  %v89_v34 = vsel %vm88_vm8, %v87_v32, -inf }
 0x11d   :  { %94 = vmin.xlane.f32.xlu2 %v93_v33  ;;  %90 = vmax.xlane.f32.xlu1 %v89_v34 }
 0x190   :  { %v95_v35 = vpop.xlane.xlu2 %94  ;;  %v91_v36 = vpop.xlane.xlu1 %90 }
 0x191   :  { %139 = vrsqrt.f32 %v95_v35  ;;  %vm115_vm9 = vcmp.eq.f32.partialorder %v95_v35, inf  ;;  %v118_v50 = vand.u32 2147483648, %v95_v35  ;;  %vm117_vm10 = vcmp.eq.f32.partialorder %v95_v35, 0.0 }
 0x192   :  { %141 = vrsqrt.f32 %v91_v36  ;;  %vm103_vm11 = vcmp.eq.f32.partialorder %v91_v36, inf  ;;  %v106_v53 = vand.u32 2147483648, %v91_v36  ;;  %vm105_vm12 = vcmp.eq.f32.partialorder %v91_v36, 0.0 }
 0x197   :  { %v140_v37 = vpop.eup %139 }
 0x198   :  { %v142_v38 = vpop.eup %141  ;;  %v109_v39 = vmul.f32 %v140_v37, %v95_v35 }
 0x199   :  { %v97_v40 = vmul.f32 %v142_v38, %v91_v36 }
 0x19a   :  { %v110_v41 = vmul.f32 %v140_v37, %v109_v39 }
 0x19b   :  { %v98_v42 = vmul.f32 %v142_v38, %v97_v40 }
 0x19c   :  { %v111_v43 = vmul.f32 0.5, %v110_v41 }
 0x19d   :  { %v99_v44 = vmul.f32 0.5, %v98_v42 }
 0x19e   :  { %v112_v45 = vsub.f32 1.5, %v111_v43 }
 0x19f   :  { %v100_v46 = vsub.f32 1.5, %v99_v44 }
 0x1a0   :  { %v113_v47 = vmul.f32 %v140_v37, %v112_v45 }
 0x1a1   :  { %v101_v48 = vmul.f32 %v142_v38, %v100_v46 }
 0x1a2   :  { %v114_v49 = vmul.f32 %v113_v47, %v95_v35 }
 0x1a3   :  { %v102_v51 = vmul.f32 %v101_v48, %v91_v36 }
 0x1a4   :  { %v116_v52 = vsel %vm115_vm9, %v95_v35, %v114_v49 }
 0x1a5   :  { %v119_v54 = vsel %vm117_vm10, %v118_v50, %v116_v52  ;;  %v104_v55 = vsel %vm103_vm11, %v91_v36, %v102_v51 }
 0x1a6   :  { %v107_v56 = vsel %vm105_vm12, %v106_v53, %v104_v55 }
 0x1a7   :  { %v120_v57 = vsub.f32 %v107_v56, %v119_v54 }
 0x1a9   :  { %v121_v58 = vadd.f32 0.3, %v120_v57 }
 0x1ab   :  { %v122_v59 = vmax.f32 %v121_v58, 0.0 }
 0x1ad   :  { %124 = vst.msk [vmem:[%s182_s3] sm:$0xff] %vm123_vm13, %v122_v59 }

</bundles_post_ra>
